<compile_context>
chip_gen: v7x
topology: tpu7x:2x2x1
jax: 0.10.0
libtpu: 0.0.40
codegen_flags: <defaults>
</compile_context>

<pallas_src>
import functools

import jax
import jax.numpy as jnp
from jax.experimental import pallas as pl
from jax.experimental.pallas import tpu as pltpu


def _layernorm_kernel(x_ref, gamma_ref, beta_ref, o_ref, *,
                      epsilon, seg_d, num_segments):
    """x_ref: (tile_rows, W) block, W = seg_d * num_segments.

    Each lane-row packs `num_segments` independent logical rows of length
    `seg_d` (num_segments == 1 is the plain, unpacked layout).  The static
    Python loop is unrolled at trace time.
    """
    # torch.std default is unbiased (ddof=1): divide by (D - 1); guard D == 1.
    denom = max(seg_d - 1, 1)
    for g in range(num_segments):
        lo, hi = g * seg_d, (g + 1) * seg_d
        x = x_ref[:, lo:hi].astype(jnp.float32)

        mean = jnp.mean(x, axis=-1, keepdims=True)
        centered = x - mean
        var = jnp.sum(centered * centered, axis=-1, keepdims=True) * (1.0 / denom)
        std = jnp.sqrt(var)

        # One exact reciprocal per row on a (tile, 1) column; preserves the
        # (std + eps) semantics of the torch module.
        inv = 1.0 / (std + epsilon)

        y = centered * inv * gamma_ref[:, lo:hi] + beta_ref[:, lo:hi]
        o_ref[:, lo:hi] = y.astype(o_ref.dtype)


def _choose_tile_rows(rows, width, itemsize):
    """Pick a sublane-aligned row tile.

    Constraints:
      * ~4 MiB of *actual* HBM bytes per block per direction (amortizes the
        ~0.35 us per-step pipeline overhead, incl. for bf16 inputs).
      * each f32 upcast temporary <= ~6 MiB, so double-buffered in/out plus a
        few live f32 temps stay ~30 MiB (under the 32 MiB scoped default and
        well under v7x's 64 MiB physical VMEM).
      * >= 2 grid steps whenever possible so both v7x TensorCores get work.
    """
    lane_w = max(width, 128)                       # lanes pad to 128 in VMEM
    dma_tile = (4 * 1024 * 1024) // max(width * itemsize, 1)
    f32_tile = (6 * 1024 * 1024) // (lane_w * 4)
    tile = min(dma_tile, f32_tile, 8192)
    tile = max(8, (tile // 8) * 8)                 # multiple of 8 sublanes

    rows_rounded = ((rows + 7) // 8) * 8
    if rows_rounded >= 16:
        # Megacore: guarantee at least 2 grid steps.
        tile = min(tile, max(8, (rows_rounded // 2 // 8) * 8))
    return min(tile, rows_rounded)


def layer_norm(x, gamma, beta, epsilon=1e-6, tile_rows=None):
    """LayerNorm over the last dim of x ([B, L, D]) with torch-module semantics."""
    B, L, D = x.shape
    rows = B * L

    # Lane packing for small D: pack G = 128 // D logical rows per 128-wide
    # lane row so the HBM-side layout is lane-dense.
    if 8 <= D < 128 and 128 % D == 0 and rows % (128 // D) == 0:
        group = 128 // D
    else:
        group = 1

    width = group * D
    rows_p = rows // group
    x2d = x.reshape(rows_p, width)                 # contiguous -> free reshape
    gamma2d = jnp.tile(gamma.reshape(1, D).astype(jnp.float32), (1, group))
    beta2d = jnp.tile(beta.reshape(1, D).astype(jnp.float32), (1, group))

    if tile_rows is None:
        tile_rows = _choose_tile_rows(rows_p, width, x.dtype.itemsize)
    tile_rows = max(8, (int(tile_rows) // 8) * 8)  # keep sublane-aligned

    grid = (pl.cdiv(rows_p, tile_rows),)

    out = pl.pallas_call(
        functools.partial(_layernorm_kernel, epsilon=epsilon,
                          seg_d=D, num_segments=group),
        out_shape=jax.ShapeDtypeStruct((rows_p, width), x.dtype),
        grid_spec=pltpu.PrefetchScalarGridSpec(
            num_scalar_prefetch=0,
            grid=grid,
            in_specs=[
                pl.BlockSpec((tile_rows, width), lambda i: (i, 0)),
                pl.BlockSpec((1, width), lambda i: (0, 0)),
                pl.BlockSpec((1, width), lambda i: (0, 0)),
            ],
            out_specs=pl.BlockSpec((tile_rows, width), lambda i: (i, 0)),
        ),
        compiler_params=pltpu.CompilerParams(
            dimension_semantics=("parallel",),
            # Actual footprint ~24-30 MiB (2x-buffered 3-4 MiB in + out plus a
            # few 4-6 MiB f32 temps).  48 MiB is above v5e's 16 MiB / v6e's
            # 32 MiB scoped defaults and safely under v7x's 64 MiB physical.
            vmem_limit_bytes=48 * 1024 * 1024,
        ),
    )(x2d, gamma2d, beta2d)

    return out.reshape(B, L, D)


def _reference(x, gamma, beta, epsilon=1e-6):
    mean = jnp.mean(x, axis=-1, keepdims=True)
    std = jnp.std(x, axis=-1, keepdims=True, ddof=1)
    return gamma * (x - mean) / (std + epsilon) + beta


if __name__ == "__main__":
    # Matches nn.Parameter(torch.ones(features)) / torch.zeros(features).
    B, L, D = 2, 8, 32
    gamma = jnp.ones((D,), dtype=jnp.float32)
    beta = jnp.zeros((D,), dtype=jnp.float32)

    key = jax.random.PRNGKey(0)
    x = jax.random.normal(key, (B, L, D), dtype=jnp.float32)

    # Base case: D=32 < 128 and rows divisible by 4 -> lane-packed path.
    y = jax.block_until_ready(layer_norm(x, gamma, beta, epsilon=1e-6))
    assert jnp.allclose(y, _reference(x, gamma, beta), atol=1e-5, rtol=1e-5), \
        "mismatch vs reference (packed base case)"

    # Odd row count (21 rows, not divisible by 4): unpacked fallback with
    # cdiv grid and masked partial last tile.
    x2 = jax.random.normal(jax.random.PRNGKey(1), (3, 7, D), dtype=jnp.float32)
    y2 = jax.block_until_ready(layer_norm(x2, gamma, beta, epsilon=1e-6))
    assert jnp.allclose(y2, _reference(x2, gamma, beta), atol=1e-5, rtol=1e-5), \
        "mismatch vs reference (fallback / partial-tile case)"

    # Multi-step grid on the packed path (rows_p = 64, tile_rows = 16 -> 4 steps).
    x3 = jax.random.normal(jax.random.PRNGKey(2), (4, 64, D), dtype=jnp.float32)
    y3 = jax.block_until_ready(layer_norm(x3, gamma, beta, epsilon=1e-6,
                                          tile_rows=16))
    assert jnp.allclose(y3, _reference(x3, gamma, beta), atol=1e-5, rtol=1e-5), \
        "mismatch vs reference (packed multi-tile case)"

    # D >= 128 path (no packing, lane-dense already).
    D4 = 256
    gamma4 = jnp.ones((D4,), dtype=jnp.float32)
    beta4 = jnp.zeros((D4,), dtype=jnp.float32)
    x4 = jax.random.normal(jax.random.PRNGKey(3), (2, 16, D4), dtype=jnp.float32)
    y4 = jax.block_until_ready(layer_norm(x4, gamma4, beta4, epsilon=1e-6))
    assert jnp.allclose(y4, _reference(x4, gamma4, beta4), atol=1e-5, rtol=1e-5), \
        "mismatch vs reference (wide-D case)"

    print("KERNEL_OK")
</pallas_src>

<mosaic_0001>
module attributes {stable_mosaic.version = 11 : i64} {
  func.func @_layernorm_kernel(%arg0: i32, %arg1: memref<8x128xf32, #tpu.memory_space<vmem>>, %arg2: memref<1x128xf32, #tpu.memory_space<vmem>>, %arg3: memref<1x128xf32, #tpu.memory_space<vmem>>, %arg4: memref<8x128xf32, #tpu.memory_space<vmem>>) attributes {dimension_semantics = [#tpu.dimension_semantics<parallel>], iteration_bounds = array<i64: 1>, scalar_prefetch = 0 : i64, scratch_operands = 0 : i64, tpu.core_type = #tpu.core_type<tc>, window_params = [{transform_indices = @transform_0, window_bounds = array<i64: 8, 128>}, {pipeline_mode = #tpu.pipeline_mode<synchronous>, transform_indices = @transform_1, window_bounds = array<i64: 1, 128>}, {pipeline_mode = #tpu.pipeline_mode<synchronous>, transform_indices = @transform_2, window_bounds = array<i64: 1, 128>}, {transform_indices = @transform_3, window_bounds = array<i64: 8, 128>}]} {
    %c0 = arith.constant 0 : index
    %c0_0 = arith.constant 0 : index
    %0 = vector.load %arg1[%c0, %c0_0] : memref<8x128xf32, #tpu.memory_space<vmem>>, vector<8x32xf32>
    %cst = arith.constant dense<0.000000e+00> : vector<8xf32>
    %1 = vector.multi_reduction <add>, %0, %cst [1] : vector<8x32xf32> to vector<8xf32>
    %2 = vector.shape_cast %1 : vector<8xf32> to vector<8x1xf32>
    %cst_1 = arith.constant 3.200000e+01 : f32
    %3 = vector.broadcast %cst_1 : f32 to vector<8x1xf32>
    %4 = arith.divf %2, %3 : vector<8x1xf32>
    %5 = vector.broadcast %4 : vector<8x1xf32> to vector<8x32xf32>
    %6 = arith.subf %0, %5 : vector<8x32xf32>
    %7 = arith.mulf %6, %6 : vector<8x32xf32>
    %cst_2 = arith.constant dense<0.000000e+00> : vector<8xf32>
    %8 = vector.multi_reduction <add>, %7, %cst_2 [1] : vector<8x32xf32> to vector<8xf32>
    %9 = vector.shape_cast %8 : vector<8xf32> to vector<8x1xf32>
    %cst_3 = arith.constant 0.0322580636 : f32
    %10 = vector.broadcast %cst_3 : f32 to vector<8x1xf32>
    %11 = arith.mulf %9, %10 : vector<8x1xf32>
    %12 = math.sqrt %11 : vector<8x1xf32>
    %cst_4 = arith.constant 9.99999997E-7 : f32
    %13 = vector.broadcast %cst_4 : f32 to vector<8x1xf32>
    %14 = arith.addf %12, %13 : vector<8x1xf32>
    %cst_5 = arith.constant 1.000000e+00 : f32
    %15 = vector.broadcast %cst_5 : f32 to vector<8x1xf32>
    %16 = arith.divf %15, %14 : vector<8x1xf32>
    %17 = vector.broadcast %16 : vector<8x1xf32> to vector<8x32xf32>
    %18 = arith.mulf %6, %17 : vector<8x32xf32>
    %c0_6 = arith.constant 0 : index
    %c0_7 = arith.constant 0 : index
    %19 = vector.load %arg2[%c0_6, %c0_7] : memref<1x128xf32, #tpu.memory_space<vmem>>, vector<1x32xf32>
    %20 = vector.broadcast %19 : vector<1x32xf32> to vector<8x32xf32>
    %21 = arith.mulf %18, %20 : vector<8x32xf32>
    %c0_8 = arith.constant 0 : index
    %c0_9 = arith.constant 0 : index
    %22 = vector.load %arg3[%c0_8, %c0_9] : memref<1x128xf32, #tpu.memory_space<vmem>>, vector<1x32xf32>
    %23 = vector.broadcast %22 : vector<1x32xf32> to vector<8x32xf32>
    %24 = arith.addf %21, %23 : vector<8x32xf32>
    %c0_10 = arith.constant 0 : index
    %c0_11 = arith.constant 0 : index
    %25 = vector.load %arg4[%c0_10, %c0_11] : memref<8x128xf32, #tpu.memory_space<vmem>>, vector<8x32xf32>
    tpu.vector_store %arg4[%c0_10, %c0_11], %24 {strides = array<i32>} : memref<8x128xf32, #tpu.memory_space<vmem>>, vector<8x32xf32>,
    %c0_12 = arith.constant 0 : index
    %c32 = arith.constant 32 : index
    %26 = vector.load %arg1[%c0_12, %c32] : memref<8x128xf32, #tpu.memory_space<vmem>>, vector<8x32xf32>
    %cst_13 = arith.constant dense<0.000000e+00> : vector<8xf32>
    %27 = vector.multi_reduction <add>, %26, %cst_13 [1] : vector<8x32xf32> to vector<8xf32>
    %28 = vector.shape_cast %27 : vector<8xf32> to vector<8x1xf32>
    %cst_14 = arith.constant 3.200000e+01 : f32
    %29 = vector.broadcast %cst_14 : f32 to vector<8x1xf32>
    %30 = arith.divf %28, %29 : vector<8x1xf32>
    %31 = vector.broadcast %30 : vector<8x1xf32> to vector<8x32xf32>
    %32 = arith.subf %26, %31 : vector<8x32xf32>
    %33 = arith.mulf %32, %32 : vector<8x32xf32>
    %cst_15 = arith.constant dense<0.000000e+00> : vector<8xf32>
    %34 = vector.multi_reduction <add>, %33, %cst_15 [1] : vector<8x32xf32> to vector<8xf32>
    %35 = vector.shape_cast %34 : vector<8xf32> to vector<8x1xf32>
    %cst_16 = arith.constant 0.0322580636 : f32
    %36 = vector.broadcast %cst_16 : f32 to vector<8x1xf32>
    %37 = arith.mulf %35, %36 : vector<8x1xf32>
    %38 = math.sqrt %37 : vector<8x1xf32>
    %cst_17 = arith.constant 9.99999997E-7 : f32
    %39 = vector.broadcast %cst_17 : f32 to vector<8x1xf32>
    %40 = arith.addf %38, %39 : vector<8x1xf32>
    %cst_18 = arith.constant 1.000000e+00 : f32
    %41 = vector.broadcast %cst_18 : f32 to vector<8x1xf32>
    %42 = arith.divf %41, %40 : vector<8x1xf32>
    %43 = vector.broadcast %42 : vector<8x1xf32> to vector<8x32xf32>
    %44 = arith.mulf %32, %43 : vector<8x32xf32>
    %c0_19 = arith.constant 0 : index
    %c32_20 = arith.constant 32 : index
    %45 = vector.load %arg2[%c0_19, %c32_20] : memref<1x128xf32, #tpu.memory_space<vmem>>, vector<1x32xf32>
    %46 = vector.broadcast %45 : vector<1x32xf32> to vector<8x32xf32>
    %47 = arith.mulf %44, %46 : vector<8x32xf32>
    %c0_21 = arith.constant 0 : index
    %c32_22 = arith.constant 32 : index
    %48 = vector.load %arg3[%c0_21, %c32_22] : memref<1x128xf32, #tpu.memory_space<vmem>>, vector<1x32xf32>
    %49 = vector.broadcast %48 : vector<1x32xf32> to vector<8x32xf32>
    %50 = arith.addf %47, %49 : vector<8x32xf32>
    %c0_23 = arith.constant 0 : index
    %c32_24 = arith.constant 32 : index
    %51 = vector.load %arg4[%c0_23, %c32_24] : memref<8x128xf32, #tpu.memory_space<vmem>>, vector<8x32xf32>
    tpu.vector_store %arg4[%c0_23, %c32_24], %50 {strides = array<i32>} : memref<8x128xf32, #tpu.memory_space<vmem>>, vector<8x32xf32>,
    %c0_25 = arith.constant 0 : index
    %c64 = arith.constant 64 : index
    %52 = vector.load %arg1[%c0_25, %c64] : memref<8x128xf32, #tpu.memory_space<vmem>>, vector<8x32xf32>
    %cst_26 = arith.constant dense<0.000000e+00> : vector<8xf32>
    %53 = vector.multi_reduction <add>, %52, %cst_26 [1] : vector<8x32xf32> to vector<8xf32>
    %54 = vector.shape_cast %53 : vector<8xf32> to vector<8x1xf32>
    %cst_27 = arith.constant 3.200000e+01 : f32
    %55 = vector.broadcast %cst_27 : f32 to vector<8x1xf32>
    %56 = arith.divf %54, %55 : vector<8x1xf32>
    %57 = vector.broadcast %56 : vector<8x1xf32> to vector<8x32xf32>
    %58 = arith.subf %52, %57 : vector<8x32xf32>
    %59 = arith.mulf %58, %58 : vector<8x32xf32>
    %cst_28 = arith.constant dense<0.000000e+00> : vector<8xf32>
    %60 = vector.multi_reduction <add>, %59, %cst_28 [1] : vector<8x32xf32> to vector<8xf32>
    %61 = vector.shape_cast %60 : vector<8xf32> to vector<8x1xf32>
    %cst_29 = arith.constant 0.0322580636 : f32
    %62 = vector.broadcast %cst_29 : f32 to vector<8x1xf32>
    %63 = arith.mulf %61, %62 : vector<8x1xf32>
    %64 = math.sqrt %63 : vector<8x1xf32>
    %cst_30 = arith.constant 9.99999997E-7 : f32
    %65 = vector.broadcast %cst_30 : f32 to vector<8x1xf32>
    %66 = arith.addf %64, %65 : vector<8x1xf32>
    %cst_31 = arith.constant 1.000000e+00 : f32
    %67 = vector.broadcast %cst_31 : f32 to vector<8x1xf32>
    %68 = arith.divf %67, %66 : vector<8x1xf32>
    %69 = vector.broadcast %68 : vector<8x1xf32> to vector<8x32xf32>
    %70 = arith.mulf %58, %69 : vector<8x32xf32>
    %c0_32 = arith.constant 0 : index
    %c64_33 = arith.constant 64 : index
    %71 = vector.load %arg2[%c0_32, %c64_33] : memref<1x128xf32, #tpu.memory_space<vmem>>, vector<1x32xf32>
    %72 = vector.broadcast %71 : vector<1x32xf32> to vector<8x32xf32>
    %73 = arith.mulf %70, %72 : vector<8x32xf32>
    %c0_34 = arith.constant 0 : index
    %c64_35 = arith.constant 64 : index
    %74 = vector.load %arg3[%c0_34, %c64_35] : memref<1x128xf32, #tpu.memory_space<vmem>>, vector<1x32xf32>
    %75 = vector.broadcast %74 : vector<1x32xf32> to vector<8x32xf32>
    %76 = arith.addf %73, %75 : vector<8x32xf32>
    %c0_36 = arith.constant 0 : index
    %c64_37 = arith.constant 64 : index
    %77 = vector.load %arg4[%c0_36, %c64_37] : memref<8x128xf32, #tpu.memory_space<vmem>>, vector<8x32xf32>
    tpu.vector_store %arg4[%c0_36, %c64_37], %76 {strides = array<i32>} : memref<8x128xf32, #tpu.memory_space<vmem>>, vector<8x32xf32>,
    %c0_38 = arith.constant 0 : index
    %c96 = arith.constant 96 : index
    %78 = vector.load %arg1[%c0_38, %c96] : memref<8x128xf32, #tpu.memory_space<vmem>>, vector<8x32xf32>
    %cst_39 = arith.constant dense<0.000000e+00> : vector<8xf32>
    %79 = vector.multi_reduction <add>, %78, %cst_39 [1] : vector<8x32xf32> to vector<8xf32>
    %80 = vector.shape_cast %79 : vector<8xf32> to vector<8x1xf32>
    %cst_40 = arith.constant 3.200000e+01 : f32
    %81 = vector.broadcast %cst_40 : f32 to vector<8x1xf32>
    %82 = arith.divf %80, %81 : vector<8x1xf32>
    %83 = vector.broadcast %82 : vector<8x1xf32> to vector<8x32xf32>
    %84 = arith.subf %78, %83 : vector<8x32xf32>
    %85 = arith.mulf %84, %84 : vector<8x32xf32>
    %cst_41 = arith.constant dense<0.000000e+00> : vector<8xf32>
    %86 = vector.multi_reduction <add>, %85, %cst_41 [1] : vector<8x32xf32> to vector<8xf32>
    %87 = vector.shape_cast %86 : vector<8xf32> to vector<8x1xf32>
    %cst_42 = arith.constant 0.0322580636 : f32
    %88 = vector.broadcast %cst_42 : f32 to vector<8x1xf32>
    %89 = arith.mulf %87, %88 : vector<8x1xf32>
    %90 = math.sqrt %89 : vector<8x1xf32>
    %cst_43 = arith.constant 9.99999997E-7 : f32
    %91 = vector.broadcast %cst_43 : f32 to vector<8x1xf32>
    %92 = arith.addf %90, %91 : vector<8x1xf32>
    %cst_44 = arith.constant 1.000000e+00 : f32
    %93 = vector.broadcast %cst_44 : f32 to vector<8x1xf32>
    %94 = arith.divf %93, %92 : vector<8x1xf32>
    %95 = vector.broadcast %94 : vector<8x1xf32> to vector<8x32xf32>
    %96 = arith.mulf %84, %95 : vector<8x32xf32>
    %c0_45 = arith.constant 0 : index
    %c96_46 = arith.constant 96 : index
    %97 = vector.load %arg2[%c0_45, %c96_46] : memref<1x128xf32, #tpu.memory_space<vmem>>, vector<1x32xf32>
    %98 = vector.broadcast %97 : vector<1x32xf32> to vector<8x32xf32>
    %99 = arith.mulf %96, %98 : vector<8x32xf32>
    %c0_47 = arith.constant 0 : index
    %c96_48 = arith.constant 96 : index
    %100 = vector.load %arg3[%c0_47, %c96_48] : memref<1x128xf32, #tpu.memory_space<vmem>>, vector<1x32xf32>
    %101 = vector.broadcast %100 : vector<1x32xf32> to vector<8x32xf32>
    %102 = arith.addf %99, %101 : vector<8x32xf32>
    %c0_49 = arith.constant 0 : index
    %c96_50 = arith.constant 96 : index
    %103 = vector.load %arg4[%c0_49, %c96_50] : memref<8x128xf32, #tpu.memory_space<vmem>>, vector<8x32xf32>
    tpu.vector_store %arg4[%c0_49, %c96_50], %102 {strides = array<i32>} : memref<8x128xf32, #tpu.memory_space<vmem>>, vector<8x32xf32>,
    return
  }
  func.func @transform_0(%arg0: i32) -> (i32, i32) {
    %c0_i32 = arith.constant 0 : i32
    %c0_i32_0 = arith.constant 0 : i32
    return %arg0, %c0_i32 : i32, i32
  }
  func.func @transform_1(%arg0: i32) -> (i32, i32) {
    %c0_i32 = arith.constant 0 : i32
    %c0_i32_0 = arith.constant 0 : i32
    %c0_i32_1 = arith.constant 0 : i32
    return %c0_i32, %c0_i32_0 : i32, i32
  }
  func.func @transform_2(%arg0: i32) -> (i32, i32) {
    %c0_i32 = arith.constant 0 : i32
    %c0_i32_0 = arith.constant 0 : i32
    %c0_i32_1 = arith.constant 0 : i32
    return %c0_i32, %c0_i32_0 : i32, i32
  }
  func.func @transform_3(%arg0: i32) -> (i32, i32) {
    %c0_i32 = arith.constant 0 : i32
    %c0_i32_0 = arith.constant 0 : i32
    return %arg0, %c0_i32 : i32, i32
  }
}

</mosaic_0001>

<bundles_post_ra>
// kernel: tpu_custom_call.1
= control target key start
LH: loop header
LB: loop body
LE: loop exit
PB: predicated region body
PF: predicated region fallthrough
CT: control target
= control target key end

     0   :  { %8 = vsyncpa [#allocation3], 0  ;;  %s397_s0 = inlined_call_operand.hbm [shape: f32[4,128], index: 0, kind: input, shape index: {}]   ;;  %s398_s1 = inlined_call_operand.vmem [shape: f32[1,128], index: 1, kind: input, shape index: {}]   ;;  %s399_s2 = inlined_call_operand.vmem [shape: f32[1,128], index: 2, kind: input, shape index: {}]   ;;  %s400_s3 = inlined_call_operand.hbm [shape: f32[4,128], index: 3, kind: output, shape index: {}]  }
   0x1   :  { %9 = vsyncpa [#allocation4], 0 }
   0x2   :  { %14 = vsyncadd [#allocation3], 64  ;;  %s309_s12 = smov [#allocation2]   ;;  %s261_s16 = scalar_lea.hbm %s397_s0, 64 }
   0x3   :  { %s15_s13 = sshll.u32 %s309_s12, 4  ;;  %p262_p0 = scmp.ne.s32.totalorder %s397_s0, %s261_s16  ;;  %s16_s13 = int_to_ptr.vmem [resolvable:$true] %s15_s13 }
   0x4   :  { %p265_p1 = scmp.lt.u32.totalorder %s261_s16, %s397_s0 }
   0x6   :  { %p267_p2 = pnand %p265_p1, %p262_p0 }
   0x8   :  { %270 = shalt.err (!%p267_p2)
}
   0x9   :  { %s271_s21 = scalar_lea.vmem %s16_s13, 64  ;;  %s275_s22 = scalar_lea.vmem %s16_s13, 128 }
   0xa   :  { %p272_p3 = scmp.ne.s32.totalorder %s16_s13, %s271_s21  ;;  %p276_p4 = scmp.lt.s32.totalorder %s16_s13, %s16_s13 }
   0xb   :  { %p277_p5 = scmp.lt.s32.totalorder %s275_s22, %s271_s21 }
   0xd   :  { %p278_p6 = por %p277_p5, %p276_p4 }
   0xf   :  { %p279_p7 = pnand %p278_p6, %p272_p3 }
  0x11   :  { %282 = shalt.err (!%p279_p7)
}
  0x12   :  { %s310_s23 = smov 64   ;;  %s311_s24 = smov 4  }
  0x13   :  { %21 = dma.hbm_to_vmem [thread:$0]  %s397_s0, 64, %s16_s13, [#allocation3], %s310_s23, %s310_s23, %s311_s24  }
  0x14   :  { %305 = dma.done.wait [#allocation3], 128  }
  0x15   :  { %306 = vsyncadd [#allocation3], 4294967168  ;;  %v70_v0 = vld [vmem:[#allocation2] sm:$0xff]  ;;  %s312_s27 = smov 96   ;;  %s313_s28 = smov 32   ;;  %vm30_vm0 = vcmask 261120  }
  0x16   :  { %72 = vrot.lane.b32.xlu0 %v70_v0, %s312_s27  ;;  %168 = vrot.lane.b32.xlu1 %v70_v0, %s313_s28  ;;  %v31_v3 = vsel %vm30_vm0, %v70_v0, 0.0  ;;  %v231_v40 = vld [vmem:[%s398_s1] ss:$0 sm:$0xff]  ;;  %vm116_vm9 = vcmask 523520   ;;  %vm164_vm10 = vcmask 785920   ;;  %vm212_vm11 = vcmask 1048320  }
  0x17   :  { %v232_v42 = vld [vmem:[%s399_s2] ss:$0 sm:$0xff] }
  0x1a   :  { %120 = vrot.lane.b32.xlu0 %v70_v0, %s310_s23 }
  0x88   :  { %v73_v1 = vpop.permute.xlu0 %72  ;;  %v169_v5 = vpop.permute.xlu1 %168 }
  0x89   :  { %v75_v2 = vsel %vm30_vm0, %v73_v1, 0.0  ;;  %v171_v7 = vsel %vm30_vm0, %v169_v5, 0.0 }
  0x8a   :  { %76 = vadd.xlane.f32.xlu1 %v75_v2 }
  0x8c   :  { %v121_v4 = vpop.permute.xlu0 %120 }
  0x8d   :  { %v123_v6 = vsel %vm30_vm0, %v121_v4, 0.0 }
  0x8e   :  { %124 = vadd.xlane.f32.xlu0 %v123_v6  ;;  %32 = vadd.xlane.f32.xlu1 %v31_v3 }
  0x92   :  { %172 = vadd.xlane.f32.xlu0 %v171_v7 }
 0x117   :  { %v77_v8 = vpop.xlane.xlu1 %76 }
 0x118   :  { %v78_v9 = vmul.f32 0.03125, %v77_v8 }
 0x11a   :  { %v355_v10 = vsub.f32 %v70_v0, %v78_v9 }
 0x11b   :  { %v125_v11 = vpop.xlane.xlu0 %124  ;;  %v33_v20 = vpop.xlane.xlu1 %32 }
 0x11c   :  { %v126_v12 = vmul.f32 0.03125, %v125_v11  ;;  %v80_v13 = vmul.f32 %v355_v10, %v355_v10  ;;  %v35_v21 = vmul.f32 0.03125, %v33_v20 }
 0x11e   :  { %v359_v14 = vsub.f32 %v70_v0, %v126_v12  ;;  %82 = vrot.lane.b32.xlu0 %v80_v13, %s312_s27  ;;  %v36_v22 = vsub.f32 %v70_v0, %v35_v21 }
 0x11f   :  { %v173_v15 = vpop.xlane.xlu0 %172 }
 0x120   :  { %v174_v16 = vmul.f32 0.03125, %v173_v15  ;;  %v128_v17 = vmul.f32 %v359_v14, %v359_v14  ;;  %v37_v23 = vmul.f32 %v36_v22, %v36_v22 }
 0x122   :  { %v363_v18 = vsub.f32 %v70_v0, %v174_v16  ;;  %130 = vrot.lane.b32.xlu1 %v128_v17, %s310_s23  ;;  %v38_v24 = vsel %vm30_vm0, %v37_v23, 0.0 }
 0x124   :  { %v176_v19 = vmul.f32 %v363_v18, %v363_v18 }
 0x126   :  { %178 = vrot.lane.b32.xlu1 %v176_v19, %s313_s28 }
 0x13d   :  { %39 = vadd.xlane.f32.xlu0 %v38_v24 }
 0x190   :  { %v83_v25 = vpop.permute.xlu0 %82 }
 0x191   :  { %v85_v26 = vsel %vm30_vm0, %v83_v25, 0.0 }
 0x192   :  { %86 = vadd.xlane.f32.xlu1 %v85_v26 }
 0x194   :  { %v131_v27 = vpop.permute.xlu1 %130 }
 0x195   :  { %v133_v28 = vsel %vm30_vm0, %v131_v27, 0.0 }
 0x196   :  { %134 = vadd.xlane.f32.xlu0 %v133_v28 }
 0x198   :  { %v179_v29 = vpop.permute.xlu1 %178 }
 0x199   :  { %v181_v30 = vsel %vm30_vm0, %v179_v29, 0.0 }
 0x19a   :  { %182 = vadd.xlane.f32.xlu0 %v181_v30 }
 0x1ca   :  { %v40_v31 = vpop.xlane.xlu0 %39 }
 0x1cb   :  { %v41_v32 = vmul.f32 0.032258064, %v40_v31 }
 0x1cd   :  { %245 = vrsqrt.f32 %v41_v32  ;;  %vm44_vm1 = vcmp.eq.f32.partialorder %v41_v32, inf  ;;  %v47_v34 = vand.u32 2147483648, %v41_v32  ;;  %vm46_vm2 = vcmp.eq.f32.partialorder %v41_v32, 0.0 }
 0x1d7   :  { %v246_v33 = vpop.eup %245 }
 0x1d8   :  { %v43_v35 = vmul.f32 %v246_v33, %v41_v32 }
 0x1da   :  { %v45_v36 = vsel %vm44_vm1, %v41_v32, %v43_v35 }
 0x1db   :  { %v48_v37 = vsel %vm46_vm2, %v47_v34, %v45_v36 }
 0x1dc   :  { %v49_v38 = vadd.f32 1e-06, %v48_v37 }
 0x1de   :  { %247 = vrcp.f32 %v49_v38 }
 0x1e8   :  { %v248_v39 = vpop.eup %247 }
 0x1e9   :  { %v52_v41 = vmul.f32 %v248_v39, %v36_v22 }
 0x1eb   :  { %v60_v43 = vmul.f32 %v231_v40, %v52_v41 }
 0x1ed   :  { %v68_v44 = vadd.f32 %v232_v42, %v60_v43 }
 0x1ef   :  { %69 = vst.msk [vmem:[#allocation5] sm:$0xff] %vm30_vm0, %v68_v44 }
 0x21f   :  { %v87_v45 = vpop.xlane.xlu1 %86 }
 0x220   :  { %v88_v46 = vmul.f32 0.032258064, %v87_v45 }
 0x222   :  { %249 = vrsqrt.f32 %v88_v46  ;;  %vm91_vm3 = vcmp.eq.f32.partialorder %v88_v46, inf  ;;  %v94_v53 = vand.u32 2147483648, %v88_v46  ;;  %vm93_vm4 = vcmp.eq.f32.partialorder %v88_v46, 0.0 }
 0x223   :  { %v135_v47 = vpop.xlane.xlu0 %134 }
 0x224   :  { %v136_v48 = vmul.f32 0.032258064, %v135_v47 }
 0x226   :  { %251 = vrsqrt.f32 %v136_v48  ;;  %vm139_vm5 = vcmp.eq.f32.partialorder %v136_v48, inf  ;;  %v142_v59 = vand.u32 2147483648, %v136_v48  ;;  %vm141_vm6 = vcmp.eq.f32.partialorder %v136_v48, 0.0 }
 0x227   :  { %v183_v49 = vpop.xlane.xlu0 %182 }
 0x228   :  { %v184_v50 = vmul.f32 0.032258064, %v183_v49 }
 0x22a   :  { %253 = vrsqrt.f32 %v184_v50  ;;  %vm187_vm7 = vcmp.eq.f32.partialorder %v184_v50, inf  ;;  %v190_v1 = vand.u32 2147483648, %v184_v50  ;;  %vm189_vm8 = vcmp.eq.f32.partialorder %v184_v50, 0.0 }
 0x22c   :  { %v250_v51 = vpop.eup %249 }
 0x22d   :  { %v90_v52 = vmul.f32 %v250_v51, %v88_v46 }
 0x22f   :  { %v92_v54 = vsel %vm91_vm3, %v88_v46, %v90_v52 }
 0x230   :  { %v252_v55 = vpop.eup %251  ;;  %v95_v56 = vsel %vm93_vm4, %v94_v53, %v92_v54 }
 0x231   :  { %v96_v57 = vadd.f32 1e-06, %v95_v56  ;;  %v138_v58 = vmul.f32 %v252_v55, %v136_v48 }
 0x233   :  { %255 = vrcp.f32 %v96_v57  ;;  %v140_v60 = vsel %vm139_vm5, %v136_v48, %v138_v58 }
 0x234   :  { %v254_v61 = vpop.eup %253  ;;  %v143_v62 = vsel %vm141_vm6, %v142_v59, %v140_v60 }
 0x235   :  { %v144_v63 = vadd.f32 1e-06, %v143_v62  ;;  %v186_v0 = vmul.f32 %v254_v61, %v184_v50 }
 0x237   :  { %257 = vrcp.f32 %v144_v63  ;;  %v188_v2 = vsel %vm187_vm7, %v184_v50, %v186_v0 }
 0x238   :  { %v191_v3 = vsel %vm189_vm8, %v190_v1, %v188_v2 }
 0x239   :  { %v192_v4 = vadd.f32 1e-06, %v191_v3 }
 0x23b   :  { %259 = vrcp.f32 %v192_v4 }
 0x23d   :  { %v256_v5 = vpop.eup %255 }
 0x23e   :  { %v99_v6 = vmul.f32 %v256_v5, %v355_v10 }
 0x240   :  { %v107_v7 = vmul.f32 %v231_v40, %v99_v6 }
 0x241   :  { %v258_v8 = vpop.eup %257 }
 0x242   :  { %v115_v9 = vadd.f32 %v232_v42, %v107_v7  ;;  %v147_v11 = vmul.f32 %v258_v8, %v359_v14 }
 0x244   :  { %117 = vst.msk [vmem:[#allocation5] sm:$0xff] %vm116_vm9, %v115_v9  ;;  %v155_v12 = vmul.f32 %v231_v40, %v147_v11 }
 0x245   :  { %v260_v13 = vpop.eup %259 }
 0x246   :  { %v163_v15 = vadd.f32 %v232_v42, %v155_v12  ;;  %v195_v16 = vmul.f32 %v260_v13, %v363_v18 }
 0x248   :  { %165 = vst.msk [vmem:[#allocation5] sm:$0xff] %vm164_vm10, %v163_v15  ;;  %v203_v17 = vmul.f32 %v231_v40, %v195_v16 }
 0x24a   :  { %v211_v19 = vadd.f32 %v232_v42, %v203_v17 }
 0x24c   :  { %213 = vst.msk [vmem:[#allocation5] sm:$0xff] %vm212_vm11, %v211_v19 }
 0x24d   :  { %218 = vsyncadd [#allocation4], 64  ;;  %s314_s1 = smov [#allocation5]  }
 0x24e   :  { %s219_s2 = sshll.u32 %s314_s1, 4  ;;  %s220_s2 = int_to_ptr.vmem [resolvable:$true] %s219_s2 }
 0x24f   :  { %s283_s5 = scalar_lea.vmem %s220_s2, 64  ;;  %s287_s6 = scalar_lea.vmem %s220_s2, 128 }
 0x250   :  { %p284_p8 = scmp.ne.s32.totalorder %s220_s2, %s283_s5  ;;  %p288_p9 = scmp.lt.s32.totalorder %s220_s2, %s220_s2 }
 0x251   :  { %p289_p10 = scmp.lt.s32.totalorder %s287_s6, %s283_s5 }
 0x253   :  { %p290_p11 = por %p289_p10, %p288_p9 }
 0x255   :  { %p291_p12 = pnand %p290_p11, %p284_p8 }
 0x257   :  { %294 = shalt.err (!%p291_p12)
}
 0x258   :  { %s295_s9 = scalar_lea.hbm %s400_s3, 64 }
 0x259   :  { %p296_p13 = scmp.ne.s32.totalorder %s400_s3, %s295_s9  ;;  %p299_p0 = scmp.lt.u32.totalorder %s295_s9, %s400_s3 }
 0x25b   :  { %p301_p1 = pnand %p299_p0, %p296_p13 }
 0x25d   :  { %304 = shalt.err (!%p301_p1)
}
 0x25e   :  { %225 = dma.vmem_to_hbm [thread:$0]  %s220_s2, 64, %s400_s3, [#allocation4], %s310_s23, %s310_s23, %s311_s24  }
 0x25f   :  { %307 = dma.done.wait [#allocation4], 128  }
 0x260   :  { %308 = vsyncadd [#allocation4], 4294967168 }
 0x261   :  { %229 = vsyncpa [#allocation3], 1 }
 0x262   :  { %230 = vsyncpa [#allocation4], 1 }

</bundles_post_ra>
